<compile_context>
chip_gen: v7x
topology: tpu7x:2x2x1
jax: 0.10.0
libtpu: 0.0.40
codegen_flags: <defaults>
</compile_context>

<pallas_src>
import functools
import math

import numpy as np
import jax
import jax.numpy as jnp
from jax import lax
from jax.experimental import pallas as pl
from jax.experimental.pallas import tpu as pltpu


def _round_up(x, m):
    return (x + m - 1) // m * m


def _vmem_capacity_bytes():
    try:
        return int(pltpu.get_tpu_info().vmem_capacity_bytes)
    except Exception:
        return 64 * 1024 * 1024        # conservative fallback (v7x per-core VMEM)


def _pick_tiles(B):
    """Per-generation (tile_m, tile_n) so pass 2 is MXU-bound, not HBM-bound."""
    kind = ""
    try:
        kind = jax.devices()[0].device_kind.lower()
    except Exception:
        pass
    if "v5" in kind:
        tm, tn = 256, 256              # ~240 flops/byte needed; 128-native MXU
    elif "v6" in kind:
        tm, tn = 512, 512              # ~650 flops/byte needed at 918 TF/s / 1.4 TB/s
    elif "v7" in kind:
        tm, tn = 256, 512              # ~311 flops/byte needed; only 64 MiB VMEM
    else:
        tm, tn = 256, 512
    if 2 * B <= tm:                    # tiny problems: one block per half
        t = max(8, _round_up(B, 8))
        tm = tn = t
    return tm, tn


def _pass2_footprint(tm, tn, d_pad, mxu_bytes):
    return ((2 * tm + 2 * tn) * d_pad * mxu_bytes    # double-buffered q / k streams
            + 6 * tm * tn * 4                        # s / exp f32 temporaries (generous)
            + 6 * tm * 128 * 4                       # w, out, scratch (lane-padded)
            + (4 << 20))                             # Mosaic internal scratch headroom


def _fit_vmem(tm, tn, d_pad, mxu_bytes, cap):
    budget = int(cap * 0.45)
    while _pass2_footprint(tm, tn, d_pad, mxu_bytes) > budget and (tm > 128 or tn > 128):
        if tn >= tm and tn > 128:
            tn //= 2
        elif tm > 128:
            tm //= 2
        else:
            break
    if tn % tm != 0:                   # keep partner-diagonal alignment invariant
        tm = math.gcd(tm, tn)
    return tm, tn


def _pass1_rows(tm, tn, n_pad, d_pad, mxu_bytes, cap):
    """Pass 1 is memory-bound: use the biggest row block that fits VMEM and
    divides n_pad (candidates 2*tile_n, tile_n, tile_m all divide n_pad)."""
    budget = int(cap * 0.45)
    per_row = d_pad * (2 * 4 + 2 * mxu_bytes)        # f32 in + mxu-dtype out, x2 buffers
    for r in (2 * tn, tn, tm):
        if r <= n_pad and r * per_row <= budget:
            return r
    return tm


# --------------------------------------------------------------------------
# Pass 1: row L2 normalization + temperature folding + MXU-dtype cast
# --------------------------------------------------------------------------
def _normalize_scale_kernel(rep_ref, out_ref, *, scale):
    x = rep_ref[...].astype(jnp.float32)                        # (R, Dp)
    ss = jnp.sum(x * x, axis=-1, keepdims=True)                 # (R, 1)
    # F.normalize(dim=1, eps=1e-12): x / max(||x||, 1e-12) == x * rsqrt(max(ss, 1e-24))
    inv = lax.rsqrt(jnp.maximum(ss, jnp.float32(1e-24)))        # EUP rsqrt
    out_ref[...] = (x * (inv * jnp.float32(scale))).astype(out_ref.dtype)


# --------------------------------------------------------------------------
# Pass 2: tiled masked log-sum-exp + weighted per-row loss
# --------------------------------------------------------------------------
def _infonce_tile_kernel(q_ref, k_ref, w_ref, out_ref, l_sc, pos_sc, *opt_scratch,
                         tile_m, tile_n, b_real, b_pad, n_pad, post_scale,
                         logit_cap, online):
    i = pl.program_id(0)          # query-row block   ("parallel")
    j = pl.program_id(1)          # key-row block     ("arbitrary", innermost)
    m_sc = opt_scratch[0] if online else None

    @pl.when(j == 0)
    def _init():
        l_sc[...] = jnp.zeros_like(l_sc)
        if online:
            m_sc[...] = jnp.full_like(m_sc, -1e30)

    q = q_ref[...]                                              # (TM, Dp) mxu dtype
    k = k_ref[...]                                              # (TN, Dp) mxu dtype
    # Similarity tile on the MXU; contract last dims directly (no k.T copy).
    # TODO(synk): confirm via pl.lower_as_mlir that no vxpose of the k tile is
    # emitted; if one appears, feed a pre-transposed (Dp, TN) key stream instead.
    s = lax.dot_general(q, k, dimension_numbers=(((1,), (1,)), ((), ())),
                        preferred_element_type=jnp.float32)     # (TM, TN) f32
    if post_scale != 1.0:                                       # un-folded 1/temperature
        s = s * jnp.float32(post_scale)

    # One (TM,1) row iota + one (1,TN) col iota; all comparisons broadcast.
    row_l = lax.broadcasted_iota(jnp.int32, (tile_m, 1), 0)
    col_l = lax.broadcasted_iota(jnp.int32, (1, tile_n), 1)
    rows = i * tile_m + row_l
    cols = j * tile_n + col_l

    # Positive logit: partner diagonal of the raw s tile on the grid step whose
    # key block holds this query block's partners (no third input stream).
    # Alignment guaranteed by tile_n % tile_m == 0 and b_pad % tile_n == 0.
    partner_start = (i * tile_m + b_pad) % n_pad
    j_partner = partner_start // tile_n
    off = partner_start % tile_n

    @pl.when(j == j_partner)
    def _grab_pos():
        pos_mask = col_l == (row_l + off)
        pos_sc[...] = jnp.sum(jnp.where(pos_mask, s, jnp.float32(0.0)),
                              axis=-1, keepdims=True)           # (TM, 1)

    invalid = cols == rows                                      # self-similarity
    if b_real != b_pad:                                         # skipped when tile-aligned
        col_real = (cols < b_real) | ((cols >= b_pad) & (cols < b_pad + b_real))
        invalid = invalid | jnp.logical_not(col_real)
    s = jnp.where(invalid, jnp.float32(-1e30), s)

    if online:
        # Online-softmax fallback (very small temperatures).  No second mask:
        # exp(-1e30 - m_new) underflows to exactly 0, and any garbage added
        # before a row's first valid column is rescaled away by exp(m_prev-m_new).
        m_prev = m_sc[...]
        m_new = jnp.maximum(m_prev, jnp.max(s, axis=-1, keepdims=True))
        l_sc[...] = (jnp.exp(m_prev - m_new) * l_sc[...]
                     + jnp.sum(jnp.exp(s - m_new), axis=-1, keepdims=True))
        m_sc[...] = m_new
    else:
        # |s| <= logit_cap for all valid entries (cosine * 1/T), so a fixed cap
        # replaces the running max: no XLU max-reduce, no rescale, no m scratch.
        l_sc[...] += jnp.sum(jnp.exp(s - jnp.float32(logit_cap)),
                             axis=-1, keepdims=True)

    @pl.when(j == pl.num_programs(1) - 1)
    def _finalize():
        if online:
            lse = m_sc[...] + jnp.log(l_sc[...])
        else:
            lse = jnp.float32(logit_cap) + jnp.log(l_sc[...])
        out_ref[...] = (lse - pos_sc[...]) * w_ref[...]         # weighted per-row loss


# --------------------------------------------------------------------------
# Wrapper
# --------------------------------------------------------------------------
def infonce_pallas(zl, zr, temperature, weights=None, use_cosine_similarity=True,
                   mxu_dtype=jnp.bfloat16, tile_m=None, tile_n=None):
    """InfoNCE / NT-Xent loss.  zl, zr: (B, D).  Returns scalar f32 loss.

    After row L2 normalization cosine similarity equals the dot product, so
    both `use_cosine_similarity` settings reduce to the same kernel (the
    reference forward always normalizes first).
    """
    if zl.ndim == 1:
        zl, zr = zl[None, :], zr[None, :]
    B, D = zl.shape
    d_pad = _round_up(D, 128)                       # lane-dense feature dim
    mxu_bytes = jnp.dtype(mxu_dtype).itemsize
    cap = _vmem_capacity_bytes()

    if tile_m is None or tile_n is None:
        tm, tn = _pick_tiles(B)
    else:
        tm, tn = tile_m, tile_n
    tm, tn = _fit_vmem(tm, tn, d_pad, mxu_bytes, cap)

    b_pad = _round_up(B, tn)            # key-tile aligned => partner diag in one block
    n_pad = 2 * b_pad                   # even number of row blocks => balanced 2-TC split

    # Glue (cheap O(n*D)): concat + zero-pad in native dtype; pass 1 normalizes.
    def _pad(z):
        return jnp.pad(z, ((0, b_pad - B), (0, d_pad - D)))
    rep = jnp.concatenate([_pad(zr), _pad(zl)], axis=0)          # (n_pad, d_pad)

    if weights is None:
        w_half = jnp.full((B,), 1.0 / (2 * B), dtype=jnp.float32)
    else:
        w_half = jnp.reshape(weights, (-1,)).astype(jnp.float32)
        w_half = w_half / (2.0 * jnp.sum(w_half))
    w_half = jnp.pad(w_half, (0, b_pad - B))                     # padded rows: weight 0
    w = jnp.concatenate([w_half, w_half]).reshape(n_pad, 1)

    # Temperature handling: fold sqrt(1/T) into the operands unless T is small
    # enough that bf16 quantization of the folded operand matters; then scale
    # the f32 MXU output instead.
    inv_t = 1.0 / float(temperature)
    fold = (float(temperature) >= 0.1) or mxu_dtype == jnp.float32
    scale = inv_t ** 0.5 if fold else 1.0
    post_scale = 1.0 if fold else inv_t
    online = (2.0 * inv_t) >= 80.0      # fixed-cap LSE is safe when 2/T < ~80

    vmem_limit = int(min(cap * 0.7,
                         max(2 * _pass2_footprint(tm, tn, d_pad, mxu_bytes), 32 << 20)))

    # ---- Pass 1: normalize + scale + cast once (memory-bound, big row blocks).
    rows1 = _pass1_rows(tm, tn, n_pad, d_pad, mxu_bytes, cap)
    rep_n = pl.pallas_call(
        functools.partial(_normalize_scale_kernel, scale=scale),
        out_shape=jax.ShapeDtypeStruct((n_pad, d_pad), mxu_dtype),
        grid=(n_pad // rows1,),
        in_specs=[pl.BlockSpec((rows1, d_pad), lambda i: (i, 0))],
        out_specs=pl.BlockSpec((rows1, d_pad), lambda i: (i, 0)),
        compiler_params=pltpu.CompilerParams(
            dimension_semantics=("parallel",),
            vmem_limit_bytes=vmem_limit),
    )(rep)

    # ---- Pass 2: tiled masked LSE over key blocks + weighted per-row loss.
    kernel = functools.partial(
        _infonce_tile_kernel, tile_m=tm, tile_n=tn, b_real=B, b_pad=b_pad,
        n_pad=n_pad, post_scale=post_scale, logit_cap=inv_t, online=online)

    scratch = [pltpu.VMEM((tm, 1), jnp.float32),     # running denominator
               pltpu.VMEM((tm, 1), jnp.float32)]     # positive logit
    if online:
        scratch.append(pltpu.VMEM((tm, 1), jnp.float32))   # running max (fallback only)

    per_row = pl.pallas_call(
        kernel,
        out_shape=jax.ShapeDtypeStruct((n_pad, 1), jnp.float32),
        grid=(n_pad // tm, n_pad // tn),
        in_specs=[
            pl.BlockSpec((tm, d_pad), lambda i, j: (i, 0)),      # query rows
            pl.BlockSpec((tn, d_pad), lambda i, j: (j, 0)),      # key rows
            pl.BlockSpec((tm, 1), lambda i, j: (i, 0)),          # per-row weights
        ],
        out_specs=pl.BlockSpec((tm, 1), lambda i, j: (i, 0)),
        scratch_shapes=scratch,
        compiler_params=pltpu.CompilerParams(
            dimension_semantics=("parallel", "arbitrary"),
            vmem_limit_bytes=vmem_limit),
    )(rep_n, rep_n, w)

    # TODO(synk): fold this O(n) weighted-row sum into the finalize step with a
    # lane-dense per-block partial to avoid the (tile,1) masked stores entirely.
    return jnp.sum(per_row)


# --------------------------------------------------------------------------
# Pure numpy transcription of the PyTorch forward (for verification)
# --------------------------------------------------------------------------
def _reference_numpy(zl, zr, temperature, weights=None):
    zl = np.asarray(zl, np.float32)
    zr = np.asarray(zr, np.float32)
    B, _ = zl.shape
    n = 2 * B
    zl_n = zl / np.maximum(np.linalg.norm(zl, axis=1, keepdims=True), 1e-12)
    zr_n = zr / np.maximum(np.linalg.norm(zr, axis=1, keepdims=True), 1e-12)
    rep = np.concatenate([zr_n, zl_n], axis=0)
    sim = rep @ rep.T
    l_pos = np.diagonal(sim, offset=B)
    r_pos = np.diagonal(sim, offset=-B)
    positives = np.concatenate([l_pos, r_pos]).reshape(n, 1)
    mask = ~((np.eye(n) + np.eye(n, k=B) + np.eye(n, k=-B)).astype(bool))
    negatives = sim[mask].reshape(n, -1)
    logits = np.concatenate([positives, negatives], axis=1) / temperature
    m = logits.max(axis=1, keepdims=True)
    lse = m[:, 0] + np.log(np.exp(logits - m).sum(axis=1))
    loss = lse - logits[:, 0]
    if weights is None:
        w = np.full((n,), 1.0 / n, np.float32)
    else:
        weights = np.asarray(weights, np.float32).reshape(-1)
        w = np.concatenate([weights, weights])
        w = w / w.sum()
    return float(np.dot(loss, w))


if __name__ == "__main__":
    key = jax.random.PRNGKey(0)
    k1, k2, k3 = jax.random.split(key, 3)

    batch, hidden = 8, 32
    temperature = 0.5

    zl = jax.random.normal(k1, (batch, hidden), dtype=jnp.float32)
    zr = jax.random.normal(k2, (batch, hidden), dtype=jnp.float32)
    weights = jax.random.uniform(k3, (batch,), dtype=jnp.float32) + 0.1

    # f32-MXU path: tight check.  bf16-MXU path (default, fast): loose check.
    for mxu_dtype, tol in ((jnp.float32, 1e-4), (jnp.bfloat16, 2e-2)):
        for w_arg in (None, weights):
            loss = infonce_pallas(zl, zr, temperature, weights=w_arg,
                                  mxu_dtype=mxu_dtype)
            jax.block_until_ready(loss)
            ref = _reference_numpy(zl, zr, temperature,
                                   None if w_arg is None else np.asarray(w_arg))
            got = float(np.asarray(loss))
            assert np.allclose(got, ref, rtol=tol, atol=tol), (mxu_dtype, got, ref)

    print("KERNEL_OK")
</pallas_src>

<mosaic_0001>
module attributes {stable_mosaic.version = 11 : i64} {
  func.func @_normalize_scale_kernel(%arg0: i32, %arg1: memref<16x128xf32, #tpu.memory_space<vmem>>, %arg2: memref<16x128xf32, #tpu.memory_space<vmem>>) attributes {dimension_semantics = [#tpu.dimension_semantics<parallel>], iteration_bounds = array<i64: 1>, scalar_prefetch = 0 : i64, scratch_operands = 0 : i64, tpu.core_type = #tpu.core_type<tc>, window_params = [{transform_indices = @transform_0, window_bounds = array<i64: 16, 128>}, {transform_indices = @transform_1, window_bounds = array<i64: 16, 128>}]} {
    %c0 = arith.constant 0 : index
    %c0_0 = arith.constant 0 : index
    %0 = vector.load %arg1[%c0, %c0_0] : memref<16x128xf32, #tpu.memory_space<vmem>>, vector<16x128xf32>
    %1 = arith.mulf %0, %0 : vector<16x128xf32>
    %cst = arith.constant dense<0.000000e+00> : vector<16xf32>
    %2 = vector.multi_reduction <add>, %1, %cst [1] : vector<16x128xf32> to vector<16xf32>
    %3 = vector.shape_cast %2 : vector<16xf32> to vector<16x1xf32>
    %cst_1 = arith.constant 1.000000e-24 : f32
    %4 = vector.broadcast %cst_1 : f32 to vector<16x1xf32>
    %5 = arith.maximumf %3, %4 : vector<16x1xf32>
    %6 = math.rsqrt %5 : vector<16x1xf32>
    %cst_2 = arith.constant 1.41421354 : f32
    %7 = vector.broadcast %cst_2 : f32 to vector<16x1xf32>
    %8 = arith.mulf %6, %7 : vector<16x1xf32>
    %9 = vector.broadcast %8 : vector<16x1xf32> to vector<16x128xf32>
    %10 = arith.mulf %0, %9 : vector<16x128xf32>
    %c0_3 = arith.constant 0 : index
    %c0_4 = arith.constant 0 : index
    %11 = vector.load %arg2[%c0_3, %c0_4] : memref<16x128xf32, #tpu.memory_space<vmem>>, vector<16x128xf32>
    tpu.vector_store %arg2[%c0_3, %c0_4], %10 {strides = array<i32>} : memref<16x128xf32, #tpu.memory_space<vmem>>, vector<16x128xf32>,
    return
  }
  func.func @transform_0(%arg0: i32) -> (i32, i32) {
    %c0_i32 = arith.constant 0 : i32
    %c0_i32_0 = arith.constant 0 : i32
    return %arg0, %c0_i32 : i32, i32
  }
  func.func @transform_1(%arg0: i32) -> (i32, i32) {
    %c0_i32 = arith.constant 0 : i32
    %c0_i32_0 = arith.constant 0 : i32
    return %arg0, %c0_i32 : i32, i32
  }
}

</mosaic_0001>

<bundles_post_ra>
// kernel: tpu_custom_call.1
= control target key start
LH: loop header
LB: loop body
LE: loop exit
PB: predicated region body
PF: predicated region fallthrough
CT: control target
= control target key end

     0   :  { %6 = vsyncpa [#allocation3], 0  ;;  %s158_s0 = inlined_call_operand.hbm [shape: f32[16,128], index: 0, kind: input, shape index: {}]   ;;  %s159_s1 = inlined_call_operand.hbm [shape: f32[16,128], index: 1, kind: output, shape index: {}]  }
   0x1   :  { %7 = vsyncpa [#allocation4], 0  ;;  %s114_s6 = smov [#allocation2]   ;;  %s66_s10 = scalar_lea.hbm %s158_s0, 256 }
   0x2   :  { %s13_s7 = sshll.u32 %s114_s6, 4  ;;  %p67_p0 = scmp.ne.s32.totalorder %s158_s0, %s66_s10  ;;  %s14_s7 = int_to_ptr.vmem [resolvable:$true] %s13_s7 }
   0x3   :  { %p70_p1 = scmp.lt.u32.totalorder %s66_s10, %s158_s0 }
   0x5   :  { %p72_p2 = pnand %p70_p1, %p67_p0 }
   0x7   :  { %75 = shalt.err (!%p72_p2)
}
   0x8   :  { %s76_s15 = scalar_lea.vmem %s14_s7, 256  ;;  %p81_p4 = scmp.lt.s32.totalorder %s14_s7, %s14_s7 }
   0x9   :  { %p77_p3 = scmp.ne.s32.totalorder %s14_s7, %s76_s15  ;;  %p82_p5 = scmp.lt.s32.totalorder %s76_s15, %s76_s15 }
   0xb   :  { %p83_p6 = por %p82_p5, %p81_p4 }
   0xd   :  { %p84_p7 = pnand %p83_p6, %p77_p3 }
   0xf   :  { %87 = shalt.err (!%p84_p7)
}
  0x10   :  { %s115_s16 = smov 128   ;;  %s116_s17 = smov 8  }
  0x11   :  { %19 = dma.hbm_to_vmem [thread:$0]  %s158_s0, 256, %s14_s7, [#allocation3], %s115_s16, %s115_s16, %s116_s17  }
  0x12   :  { %110 = dma.done.wait [#allocation3], 256  }
  0x13   :  { %111 = vsyncadd [#allocation3], 4294967040  ;;  %v23_v0 = vld [vmem:[#allocation2] sm:$0xff]  ;;  %v24_v1 = vld [vmem:[#allocation2 + $0x8] sm:$0xff]  ;;  %s117_s20 = smov [#allocation5]  }
  0x14   :  { %v25_v2 = vmul.f32 %v23_v0, %v23_v0  ;;  %v26_v3 = vmul.f32 %v24_v1, %v24_v1  ;;  %s46_s0 = sshll.u32 %s117_s20, 4  ;;  %s47_s0 = int_to_ptr.vmem [resolvable:$true] %s46_s0 }
  0x15   :  { %s88_s21 = scalar_lea.vmem %s47_s0, 256  ;;  %p93_p9 = scmp.lt.s32.totalorder %s47_s0, %s47_s0 }
  0x16   :  { %27 = vadd.xlane.f32.xlu0 %v25_v2  ;;  %p89_p8 = scmp.ne.s32.totalorder %s47_s0, %s88_s21  ;;  %p94_p10 = scmp.lt.s32.totalorder %s88_s21, %s88_s21 }
  0x18   :  { %p95_p11 = por %p94_p10, %p93_p9 }
  0x1a   :  { %29 = vadd.xlane.f32.xlu0 %v26_v3  ;;  %p96_p12 = pnand %p95_p11, %p89_p8 }
  0xa3   :  { %v28_v4 = vpop.xlane.xlu0 %27 }
  0xa4   :  { %v31_v5 = vmax.f32 %v28_v4, 1e-24 }
  0xa6   :  { %62 = vrsqrt.f32 %v31_v5 }
  0xa7   :  { %v30_v6 = vpop.xlane.xlu0 %29 }
  0xa8   :  { %v32_v7 = vmax.f32 %v30_v6, 1e-24 }
  0xaa   :  { %64 = vrsqrt.f32 %v32_v7 }
  0xb0   :  { %v63_v8 = vpop.eup %62 }
  0xb1   :  { %v35_v9 = vmul.f32 1.4142135, %v63_v8 }
  0xb3   :  { %v37_v10 = vmul.f32 %v35_v9, %v23_v0 }
  0xb4   :  { %v65_v11 = vpop.eup %64 }
  0xb5   :  { %v36_v12 = vmul.f32 1.4142135, %v65_v11  ;;  %39 = vst [vmem:[#allocation5] sm:$0xff] %v37_v10 }
  0xb7   :  { %v38_v13 = vmul.f32 %v36_v12, %v24_v1 }
  0xb9   :  { %40 = vst [vmem:[#allocation5 + $0x8] sm:$0xff] %v38_v13 }
  0xba   :  { %99 = shalt.err (!%p96_p12)
}
  0xbb   :  { %s100_s24 = scalar_lea.hbm %s159_s1, 256 }
  0xbc   :  { %p101_p13 = scmp.ne.s32.totalorder %s159_s1, %s100_s24  ;;  %p104_p0 = scmp.lt.u32.totalorder %s100_s24, %s159_s1 }
  0xbe   :  { %p106_p1 = pnand %p104_p0, %p101_p13 }
  0xc0   :  { %109 = shalt.err (!%p106_p1)
}
  0xc1   :  { %52 = dma.vmem_to_hbm [thread:$0]  %s47_s0, 256, %s159_s1, [#allocation4], %s115_s16, %s115_s16, %s116_s17  }
  0xc2   :  { %112 = dma.done.wait [#allocation4], 256  }
  0xc3   :  { %113 = vsyncadd [#allocation4], 4294967040 }
  0xc4   :  { %56 = vsyncpa [#allocation3], 1 }
  0xc5   :  { %57 = vsyncpa [#allocation4], 1 }

</bundles_post_ra>
